<compile_context>
chip_gen: v7x
topology: tpu7x:2x2x1
jax: 0.10.0
libtpu: 0.0.40
codegen_flags: <defaults>
</compile_context>

<pallas_src>
import math
from functools import partial

import jax
import jax.numpy as jnp
from jax.experimental import pallas as pl
from jax.experimental.pallas import tpu as pltpu


def _cdiv(a, b):
    return -(-a // b)


def _round_up(x, m):
    return ((x + m - 1) // m) * m


def _min_grid_tiles():
    # v7x has 2 TensorCores per chip; give each one a parallel grid step.
    # v5e/v6e (1 TC) keep a single step for small batches to avoid per-step overhead.
    try:
        kind = jax.devices()[0].device_kind.lower()
    except Exception:
        return 1
    return 2 if ("v7" in kind or "7x" in kind) else 1


def dqn_kernel(x_ref, w1_ref, b1_ref, w2_ref, b2_ref, o_ref):
    # Layer 1: MXU matmul, bias add + ReLU on the VPU (idle slots).
    h = jnp.dot(x_ref[...], w1_ref[...], preferred_element_type=jnp.float32)
    h = jnp.maximum(h + b1_ref[...], 0.0)
    # Layer 2: MXU matmul + VPU bias add, unmasked lane-dense full-tile store.
    o_ref[...] = (
        jnp.dot(h, w2_ref[...], preferred_element_type=jnp.float32) + b2_ref[...]
    )


def fold_params(w1, b1, w2, b2):
    """Pad params once to tile-aligned shapes (hoisted out of the step path).

    w1: (in_features, hidden)   b1: (hidden,) or (1, hidden)
    w2: (hidden, n_actions)     b2: (n_actions,) or (1, n_actions)
    Returns (w1p, b1p, w2p, b2p) float32 with
      Hp = round_up(hidden, 128), Np = round_up(n_actions, 128):
      w1p: (in_features, Hp)  b1p: (1, Hp)  w2p: (Hp, Np)  b2p: (1, Np)
    """
    in_features, hidden = w1.shape
    n_actions = w2.shape[1]
    Hp = _round_up(hidden, 128)
    Np = _round_up(n_actions, 128)

    w1p = jnp.zeros((in_features, Hp), jnp.float32)
    w1p = w1p.at[:, :hidden].set(w1.astype(jnp.float32))
    b1p = jnp.zeros((1, Hp), jnp.float32)
    b1p = b1p.at[0, :hidden].set(jnp.reshape(b1, (hidden,)).astype(jnp.float32))

    w2p = jnp.zeros((Hp, Np), jnp.float32)
    w2p = w2p.at[:hidden, :n_actions].set(w2.astype(jnp.float32))
    b2p = jnp.zeros((1, Np), jnp.float32)
    b2p = b2p.at[0, :n_actions].set(jnp.reshape(b2, (n_actions,)).astype(jnp.float32))
    return w1p, b1p, w2p, b2p


def dqn_forward(x, w1p, b1p, w2p, b2p, n_actions, *, block_b=1024):
    """Q-values for a batch of observations. x: (B, in_features)."""
    B, in_features = x.shape
    Hp = w1p.shape[1]
    Np = w2p.shape[1]

    x = x.astype(jnp.float32)  # matches x.float() in the PyTorch module

    # Balanced batch tiling: TB is a multiple of 8 and padding stays small.
    block_b = max(8, _round_up(block_b, 8))
    n_tiles = max(_min_grid_tiles(), _cdiv(B, block_b))
    TB = max(8, _round_up(_cdiv(B, n_tiles), 8))
    n_tiles = _cdiv(B, TB)
    Bp = TB * n_tiles

    if Bp != B:  # pad the batch dim only (single op; skipped when aligned)
        x = jnp.pad(x, ((0, Bp - B), (0, 0)))

    flops = int(2 * Bp * (in_features * Hp + Hp * Np))
    bytes_accessed = int(
        4 * (Bp * in_features + in_features * Hp + Hp + Hp * Np + Np + Bp * Np)
    )

    out = pl.pallas_call(
        dqn_kernel,
        out_shape=jax.ShapeDtypeStruct((Bp, Np), jnp.float32),
        grid=(n_tiles,),
        in_specs=[
            # x: batch-tiled; last dim equals the full array dim (K = 6 is legal).
            pl.BlockSpec((TB, in_features), lambda i: (i, 0)),
            # Weights/biases map to block (0, 0) every step -> VMEM-resident.
            pl.BlockSpec((in_features, Hp), lambda i: (0, 0)),
            pl.BlockSpec((1, Hp), lambda i: (0, 0)),
            pl.BlockSpec((Hp, Np), lambda i: (0, 0)),
            pl.BlockSpec((1, Np), lambda i: (0, 0)),
        ],
        out_specs=pl.BlockSpec((TB, Np), lambda i: (i, 0)),  # lane-dense store
        compiler_params=pltpu.CompilerParams(
            dimension_semantics=("parallel",)),
        cost_estimate=pl.CostEstimate(
            flops=flops, transcendentals=0, bytes_accessed=bytes_accessed),
    )(x, w1p, b1p, w2p, b2p)

    return out[:B, :n_actions]


def init_linear_params(key, fan_in, fan_out):
    # Mimics PyTorch nn.Linear default init: U(-1/sqrt(fan_in), 1/sqrt(fan_in)).
    bound = 1.0 / math.sqrt(fan_in)
    kw, kb = jax.random.split(key)
    w = jax.random.uniform(kw, (fan_in, fan_out), jnp.float32, -bound, bound)
    b = jax.random.uniform(kb, (1, fan_out), jnp.float32, -bound, bound)
    return w, b


if __name__ == "__main__":
    # Acrobot-v1: observation dim = 6, n_actions = 3.
    batch = 8
    in_features = 6
    hidden = 128
    n_actions = 3

    key = jax.random.PRNGKey(0)
    kx, k1, k2 = jax.random.split(key, 3)

    x = jax.random.normal(kx, (batch, in_features), jnp.float32)
    w1, b1 = init_linear_params(k1, in_features, hidden)
    w2, b2 = init_linear_params(k2, hidden, n_actions)

    # Pad params once (outside the per-step path).
    w1p, b1p, w2p, b2p = fold_params(w1, b1, w2, b2)

    forward = jax.jit(partial(dqn_forward, n_actions=n_actions))
    out = jax.block_until_ready(forward(x, w1p, b1p, w2p, b2p))

    # Reference: plain-JAX version of the original module's math.
    ref = jnp.maximum(x @ w1 + b1, 0.0) @ w2 + b2
    assert out.shape == (batch, n_actions)
    assert jnp.allclose(out, ref, atol=1e-5, rtol=1e-5)

    print("KERNEL_OK")
</pallas_src>

<mosaic_0001>
module attributes {stable_mosaic.version = 11 : i64} {
  func.func @dqn_kernel(%arg0: i32, %arg1: memref<8x6xf32, #tpu.memory_space<vmem>>, %arg2: memref<6x128xf32, #tpu.memory_space<vmem>>, %arg3: memref<1x128xf32, #tpu.memory_space<vmem>>, %arg4: memref<128x128xf32, #tpu.memory_space<vmem>>, %arg5: memref<1x128xf32, #tpu.memory_space<vmem>>, %arg6: memref<8x128xf32, #tpu.memory_space<vmem>>) attributes {dimension_semantics = [#tpu.dimension_semantics<parallel>], iteration_bounds = array<i64: 1>, scalar_prefetch = 0 : i64, scratch_operands = 0 : i64, tpu.core_type = #tpu.core_type<tc>, window_params = [{transform_indices = @transform_0, window_bounds = array<i64: 8, 6>}, {pipeline_mode = #tpu.pipeline_mode<synchronous>, transform_indices = @transform_1, window_bounds = array<i64: 6, 128>}, {pipeline_mode = #tpu.pipeline_mode<synchronous>, transform_indices = @transform_2, window_bounds = array<i64: 1, 128>}, {pipeline_mode = #tpu.pipeline_mode<synchronous>, transform_indices = @transform_3, window_bounds = array<i64: 128, 128>}, {pipeline_mode = #tpu.pipeline_mode<synchronous>, transform_indices = @transform_4, window_bounds = array<i64: 1, 128>}, {transform_indices = @transform_5, window_bounds = array<i64: 8, 128>}]} {
    %c0 = arith.constant 0 : index
    %c0_0 = arith.constant 0 : index
    %0 = vector.load %arg1[%c0, %c0_0] : memref<8x6xf32, #tpu.memory_space<vmem>>, vector<8x6xf32>
    %c0_1 = arith.constant 0 : index
    %c0_2 = arith.constant 0 : index
    %1 = vector.load %arg2[%c0_1, %c0_2] : memref<6x128xf32, #tpu.memory_space<vmem>>, vector<6x128xf32>
    %cst = arith.constant dense<0.000000e+00> : vector<8x128xf32>
    %2 = tpu.matmul %0, %1, %cst {dimension_numbers = #tpu.dot_dimension_numbers<[1], [0], [0], [1], [0, 0, 1, 1], [], []>} : vector<8x6xf32>, vector<6x128xf32>, vector<8x128xf32> -> vector<8x128xf32>
    %c0_3 = arith.constant 0 : index
    %c0_4 = arith.constant 0 : index
    %3 = vector.load %arg3[%c0_3, %c0_4] : memref<1x128xf32, #tpu.memory_space<vmem>>, vector<1x128xf32>
    %4 = vector.broadcast %3 : vector<1x128xf32> to vector<8x128xf32>
    %5 = arith.addf %2, %4 : vector<8x128xf32>
    %cst_5 = arith.constant 0.000000e+00 : f32
    %6 = vector.broadcast %cst_5 : f32 to vector<8x128xf32>
    %7 = arith.maximumf %5, %6 : vector<8x128xf32>
    %c0_6 = arith.constant 0 : index
    %c0_7 = arith.constant 0 : index
    %8 = vector.load %arg4[%c0_6, %c0_7] : memref<128x128xf32, #tpu.memory_space<vmem>>, vector<128x128xf32>
    %cst_8 = arith.constant dense<0.000000e+00> : vector<8x128xf32>
    %9 = tpu.matmul %7, %8, %cst_8 {dimension_numbers = #tpu.dot_dimension_numbers<[1], [0], [0], [1], [0, 0, 1, 1], [], []>} : vector<8x128xf32>, vector<128x128xf32>, vector<8x128xf32> -> vector<8x128xf32>
    %c0_9 = arith.constant 0 : index
    %c0_10 = arith.constant 0 : index
    %10 = vector.load %arg5[%c0_9, %c0_10] : memref<1x128xf32, #tpu.memory_space<vmem>>, vector<1x128xf32>
    %11 = vector.broadcast %10 : vector<1x128xf32> to vector<8x128xf32>
    %12 = arith.addf %9, %11 : vector<8x128xf32>
    %c0_11 = arith.constant 0 : index
    %c0_12 = arith.constant 0 : index
    %13 = vector.load %arg6[%c0_11, %c0_12] : memref<8x128xf32, #tpu.memory_space<vmem>>, vector<8x128xf32>
    tpu.vector_store %arg6[%c0_11, %c0_12], %12 {strides = array<i32>} : memref<8x128xf32, #tpu.memory_space<vmem>>, vector<8x128xf32>,
    return
  }
  func.func @transform_0(%arg0: i32) -> (i32, i32) {
    %c0_i32 = arith.constant 0 : i32
    %c0_i32_0 = arith.constant 0 : i32
    return %arg0, %c0_i32 : i32, i32
  }
  func.func @transform_1(%arg0: i32) -> (i32, i32) {
    %c0_i32 = arith.constant 0 : i32
    %c0_i32_0 = arith.constant 0 : i32
    %c0_i32_1 = arith.constant 0 : i32
    return %c0_i32, %c0_i32_0 : i32, i32
  }
  func.func @transform_2(%arg0: i32) -> (i32, i32) {
    %c0_i32 = arith.constant 0 : i32
    %c0_i32_0 = arith.constant 0 : i32
    %c0_i32_1 = arith.constant 0 : i32
    return %c0_i32, %c0_i32_0 : i32, i32
  }
  func.func @transform_3(%arg0: i32) -> (i32, i32) {
    %c0_i32 = arith.constant 0 : i32
    %c0_i32_0 = arith.constant 0 : i32
    %c0_i32_1 = arith.constant 0 : i32
    return %c0_i32, %c0_i32_0 : i32, i32
  }
  func.func @transform_4(%arg0: i32) -> (i32, i32) {
    %c0_i32 = arith.constant 0 : i32
    %c0_i32_0 = arith.constant 0 : i32
    %c0_i32_1 = arith.constant 0 : i32
    return %c0_i32, %c0_i32_0 : i32, i32
  }
  func.func @transform_5(%arg0: i32) -> (i32, i32) {
    %c0_i32 = arith.constant 0 : i32
    %c0_i32_0 = arith.constant 0 : i32
    return %arg0, %c0_i32 : i32, i32
  }
}

</mosaic_0001>

<bundles_post_ra>
// kernel: dqn_forward.1
= control target key start
LH: loop header
LB: loop body
LE: loop exit
PB: predicated region body
PF: predicated region fallthrough
CT: control target
= control target key end

     0   :  { %10 = vsyncpa [#allocation3], 0  ;;  %s493_s0 = inlined_call_operand.hbm [shape: f32[8,6], index: 0, kind: input, shape index: {}]   ;;  %s494_s1 = inlined_call_operand.hbm [shape: f32[6,128], index: 1, kind: input, shape index: {}]   ;;  %s495_s2 = inlined_call_operand.vmem [shape: f32[1,128], index: 2, kind: input, shape index: {}]   ;;  %s496_s3 = inlined_call_operand.hbm [shape: f32[128,128], index: 3, kind: input, shape index: {}]   ;;  %s497_s4 = inlined_call_operand.vmem [shape: f32[1,128], index: 4, kind: input, shape index: {}]   ;;  %s498_s5 = inlined_call_operand.vmem [shape: f32[8,128], index: 5, kind: output, shape index: {}]  }
   0x1   :  { %11 = vsyncpa [#allocation5], 0  ;;  %s410_s18 = smov [#allocation4]   ;;  %s411_s20 = smov [#allocation2]  }
   0x2   :  { %s28_s19 = sshll.u32 %s410_s18, 4  ;;  %s18_s21 = sshll.u32 %s411_s20, 4  ;;  %s29_s19 = int_to_ptr.vmem [resolvable:$true] %s28_s19  ;;  %s19_s21 = int_to_ptr.vmem [resolvable:$true] %s18_s21 }
   0x3   :  { %s340_s24 = scalar_lea.hbm %s494_s1, 128 }
   0x4   :  { %p341_p0 = scmp.ne.s32.totalorder %s494_s1, %s340_s24  ;;  %p344_p1 = scmp.lt.u32.totalorder %s340_s24, %s494_s1 }
   0x6   :  { %p346_p2 = pnand %p344_p1, %p341_p0 }
   0x8   :  { %349 = shalt.err (!%p346_p2)
}
   0x9   :  { %s350_s29 = scalar_lea.vmem %s29_s19, 128  ;;  %p355_p4 = scmp.lt.s32.totalorder %s29_s19, %s29_s19 }
   0xa   :  { %p351_p3 = scmp.ne.s32.totalorder %s29_s19, %s350_s29  ;;  %p356_p5 = scmp.lt.s32.totalorder %s350_s29, %s350_s29 }
   0xc   :  { %p357_p6 = por %p356_p5, %p355_p4 }
   0xe   :  { %p358_p7 = pnand %p357_p6, %p351_p3 }
  0x10   :  { %361 = shalt.err (!%p358_p7)
}
  0x11   :  { %31 = dma.hbm_to_vmem [thread:$0]  %s494_s1, 128, %s29_s19, [#allocation5]  }
  0x12   :  { %s362_s9 = scalar_lea.hbm %s493_s0, 128 }
  0x13   :  { %p363_p8 = scmp.ne.s32.totalorder %s493_s0, %s362_s9  ;;  %p366_p9 = scmp.lt.u32.totalorder %s362_s9, %s493_s0 }
  0x15   :  { %p368_p10 = pnand %p366_p9, %p363_p8 }
  0x17   :  { %371 = shalt.err (!%p368_p10)
}
  0x18   :  { %s372_s14 = scalar_lea.vmem %s19_s21, 128  ;;  %p377_p12 = scmp.lt.s32.totalorder %s19_s21, %s19_s21 }
  0x19   :  { %p373_p11 = scmp.ne.s32.totalorder %s19_s21, %s372_s14  ;;  %p378_p13 = scmp.lt.s32.totalorder %s372_s14, %s372_s14 }
  0x1b   :  { %p379_p0 = por %p378_p13, %p377_p12 }
  0x1d   :  { %p380_p1 = pnand %p379_p0, %p373_p11 }
  0x1f   :  { %383 = shalt.err (!%p380_p1)
}
  0x20   :  { %21 = dma.hbm_to_vmem [thread:$0]  %s493_s0, 128, %s19_s21, [#allocation3]  }
  0x21   :  { %s412_s16 = smov [#allocation6]   ;;  %s384_s20 = scalar_lea.hbm %s496_s3, 2048 }
  0x22   :  { %s39_s17 = sshll.u32 %s412_s16, 4  ;;  %p385_p2 = scmp.ne.s32.totalorder %s496_s3, %s384_s20  ;;  %s40_s17 = int_to_ptr.vmem [resolvable:$true] %s39_s17 }
  0x23   :  { %p388_p3 = scmp.lt.u32.totalorder %s384_s20, %s496_s3 }
  0x25   :  { %p390_p4 = pnand %p388_p3, %p385_p2 }
  0x27   :  { %393 = shalt.err (!%p390_p4)
}
  0x28   :  { %s394_s26 = scalar_lea.vmem %s40_s17, 2048  ;;  %p399_p6 = scmp.lt.s32.totalorder %s40_s17, %s40_s17 }
  0x29   :  { %p395_p5 = scmp.ne.s32.totalorder %s40_s17, %s394_s26  ;;  %p400_p7 = scmp.lt.s32.totalorder %s394_s26, %s394_s26 }
  0x2b   :  { %p401_p8 = por %p400_p7, %p399_p6 }
  0x2d   :  { %p402_p9 = pnand %p401_p8, %p395_p5 }
  0x2f   :  { %405 = shalt.err (!%p402_p9)
}
  0x30   :  { %s413_s0 = smov 128   ;;  %s414_s21 = smov 8  }
  0x31   :  { %45 = dma.hbm_to_vmem [thread:$0]  %s496_s3, 2048, %s40_s17, [#allocation5], %s413_s0, %s413_s0, %s414_s21  }
  0x32   :  { %406 = dma.done.wait [#allocation3], 128  }
  0x33   :  { %407 = vsyncadd [#allocation3], 4294967168 }
  0x34   :  { %408 = dma.done.wait [#allocation5], 2176  }
  0x35   :  { %409 = vsyncadd [#allocation5], 4294965120  ;;  %v415_v0 = vmov 0.0   ;;  %vm416_vm0 = vmmov 0   ;;  %v417_v1 = vmov 0.0|0.0   ;;  %vm70_vm1 = vcmask 1045504  }
  0x36   :  { %268 = vmatprep.subr.mxu0 %v415_v0  ;;  %270 = vmatprep.mubr.msk.f32.mxu0 %vm416_vm0, %v415_v0  ;;  %vm66_vm2 = vcmask 48128   ;;  %v58_v2 = vld [vmem:[#allocation4] sm:$0x3f]  ;;  %v57_v3 = vld [vmem:[#allocation2] sm:$0xff]  ;;  %v145_v4 = vld [vmem:[#allocation6] sm:$0xff] }
  0x37   :  { %308 = vmatprep.subr.bf16.mxu1 %v417_v1  ;;  %305 = vmatprep.mubr.msk.f32.mxu1 %vm416_vm0, %v415_v0  ;;  %v146_v5 = vld [vmem:[#allocation6 + $0x8] sm:$0xff]  ;;  %v147_v6 = vld [vmem:[#allocation6 + $0x10] sm:$0xff]  ;;  %v148_v7 = vld [vmem:[#allocation6 + $0x18] sm:$0xff] }
  0x38   :  { %269 = vmatpush3.msk.msra.mxu0 %vm70_vm1, %v58_v2  ;;  %v309_v8 = vpack.c.bf16 %v146_v5, %v145_v4  ;;  %v312_v9 = vpack.c.bf16 %v148_v7, %v147_v6  ;;  %v149_v10 = vld [vmem:[#allocation6 + $0x20] sm:$0xff]  ;;  %v150_v11 = vld [vmem:[#allocation6 + $0x28] sm:$0xff]  ;;  %v151_v13 = vld [vmem:[#allocation6 + $0x30] sm:$0xff] }
  0x39   :  { %271 = vmatmul.mubr.msk.f32.vlgmr.msra.gmra.mrb[0].mxu0 %vm66_vm2, %v57_v3  ;;  %v315_v12 = vpack.c.bf16 %v150_v11, %v149_v10  ;;  %v152_v14 = vld [vmem:[#allocation6 + $0x38] sm:$0xff]  ;;  %v153_v16 = vld [vmem:[#allocation6 + $0x40] sm:$0xff]  ;;  %v154_v17 = vld [vmem:[#allocation6 + $0x48] sm:$0xff] }
  0x3a   :  { %310 = vmatpush3.bf16.msra.mxu1 %v309_v8  ;;  %v318_v15 = vpack.c.bf16 %v152_v14, %v151_v13  ;;  %v321_v18 = vpack.c.bf16 %v154_v17, %v153_v16  ;;  %v155_v19 = vld [vmem:[#allocation6 + $0x50] sm:$0xff]  ;;  %v156_v20 = vld [vmem:[#allocation6 + $0x58] sm:$0xff]  ;;  %v157_v22 = vld [vmem:[#allocation6 + $0x60] sm:$0xff] }
  0x3b   :  { %311 = vmatprep.subr.bf16.mxu1 %v417_v1  ;;  %v324_v21 = vpack.c.bf16 %v156_v20, %v155_v19  ;;  %v158_v23 = vld [vmem:[#allocation6 + $0x68] sm:$0xff]  ;;  %v159_v25 = vld [vmem:[#allocation6 + $0x70] sm:$0xff]  ;;  %v160_v26 = vld [vmem:[#allocation6 + $0x78] sm:$0xff] }
  0x3c   :  { %v327_v24 = vpack.c.bf16 %v158_v23, %v157_v22  ;;  %v330_v27 = vpack.c.bf16 %v160_v26, %v159_v25  ;;  %v245_v28 = vld [vmem:[%s495_s2] ss:$0 sm:$0xff] }
  0x3d   :  { %v248_v33 = vld [vmem:[%s497_s4] ss:$0 sm:$0xff] }
  0x3e   :  { %313 = vmatpush3.bf16.msra.mxu1 %v312_v9 }
  0x3f   :  { %314 = vmatprep.subr.bf16.mxu1 %v417_v1 }
  0x42   :  { %316 = vmatpush3.bf16.msra.mxu1 %v315_v12 }
  0x43   :  { %317 = vmatprep.subr.bf16.mxu1 %v417_v1 }
  0x46   :  { %319 = vmatpush3.bf16.msra.mxu1 %v318_v15 }
  0x47   :  { %320 = vmatprep.subr.bf16.mxu1 %v417_v1 }
  0x4a   :  { %322 = vmatpush3.bf16.msra.mxu1 %v321_v18 }
  0x4b   :  { %323 = vmatprep.subr.bf16.mxu1 %v417_v1 }
  0x4e   :  { %325 = vmatpush3.bf16.msra.mxu1 %v324_v21 }
  0x4f   :  { %326 = vmatprep.subr.bf16.mxu1 %v417_v1 }
  0x52   :  { %328 = vmatpush3.bf16.msra.mxu1 %v327_v24 }
  0x53   :  { %329 = vmatprep.subr.bf16.mxu1 %v417_v1 }
  0x56   :  { %331 = vmatpush3.bf16.msra.mxu1 %v330_v27 }
 0x10c   :  { %v140_v29 = vpop.f32.mrb[0].mxu0 }
 0x10d   :  { %v141_v30 = vadd.f32 %v245_v28, %v140_v29  ;;  %v272_v31 = vpop.f32.mrb[1].mxu0 }
 0x10f   :  { %v144_v32 = vmax.f32 %v141_v30, 0.0 }
 0x111   :  { %306 = vmatmul.mubr.f32.vlgmr.msra.gmra.mrb[0].mxu1 %v144_v32 }
 0x1e4   :  { %v234_v34 = vpop.f32.mrb[0].mxu1 }
 0x1e5   :  { %v235_v35 = vadd.f32 %v248_v33, %v234_v34  ;;  %v307_v36 = vpop.f32.mrb[1].mxu1 }
 0x1e7   :  { %238 = vst [vmem:[%s498_s5] sm:$0xff] %v235_v35 }
 0x1e8   :  { %243 = vsyncpa [#allocation3], 1 }
 0x1e9   :  { %244 = vsyncpa [#allocation5], 1 }

</bundles_post_ra>
